<compile_context>
chip_gen: v5e
topology: v5e:2x2
jax: 0.10.0
libtpu: 0.0.40
codegen_flags: <defaults>
</compile_context>

<pallas_src>
import math

import jax
import jax.numpy as jnp
from jax import lax
from jax.experimental import pallas as pl
from jax.experimental.pallas import tpu as pltpu

_LANES = 128


def _mlp_kernel(x_ref, w_in_ref, b_in_ref, w_mid_ref, b_mid_ref,
                w_out_ref, b_out_ref, o_ref):
    # Per grid step (batch-in-lanes):
    #   x_ref:     (4, TILE_B)   bf16
    #   w_in_ref:  (H, 4)        bf16    b_in_ref:  (H, 1)    act dtype
    #   w_mid_ref: (L, H, H)     bf16    b_mid_ref: (L, H, 1) act dtype
    #   w_out_ref: (2, H)        bf16    b_out_ref: (2, 1)    f32
    #   o_ref:     (2, TILE_B)   f32
    cdt = w_in_ref.dtype   # bf16: MXU input dtype
    adt = b_in_ref.dtype   # activation dtype: bf16 on v6e/v7x, f32 on v5e/older

    def act(z_f32, b):
        # bias-add + tanh in `adt` (EUP/VPU); cast back to cdt for next matmul.
        return jnp.tanh(z_f32.astype(adt) + b).astype(cdt)

    # Input layer: (H, 4) @ (4, TILE_B) -> (H, TILE_B), f32 accumulation.
    h = act(jnp.dot(w_in_ref[...], x_ref[...],
                    preferred_element_type=jnp.float32), b_in_ref[...])

    num_mid = w_mid_ref.shape[0]  # static
    if num_mid <= 8:
        # Unroll at trace time: static indexing, full LLO scheduler visibility.
        for l in range(num_mid):
            h = act(jnp.dot(w_mid_ref[l], h, preferred_element_type=jnp.float32),
                    b_mid_ref[l])
    else:
        # Deep stacks: bounded loop with a small unroll factor.
        def body(l, h):
            return act(jnp.dot(w_mid_ref[l], h,
                               preferred_element_type=jnp.float32),
                       b_mid_ref[l])
        h = lax.fori_loop(0, num_mid, body, h, unroll=4)

    out = jnp.dot(w_out_ref[...], h, preferred_element_type=jnp.float32)
    o_ref[...] = (out + b_out_ref[...]).astype(o_ref.dtype)


def _activation_dtype():
    """bf16 bias-add/tanh on generations with bf16 VPU+EUP (v6e/v7x), else f32."""
    try:
        kind = jax.devices()[0].device_kind.lower()
    except Exception:
        return jnp.float32
    if any(tag in kind for tag in ("v6", "v7", "6e", "7x")):
        return jnp.bfloat16
    return jnp.float32   # v5e and older: no bf16 VPU/EUP -> keep f32 elementwise


def _pick_tile_b(B, max_tile=1024):
    """Lane-dense tile (multiple of 128), capped, and >= 2 grid steps when B
    allows it so the 'parallel' axis can be split across v7x's 2 TensorCores."""
    if B <= _LANES:
        return _LANES
    half = -(-B // 2)
    tile = -(-half // _LANES) * _LANES
    return min(max_tile, tile)


def nn_forward_t(x_t, params, *, tile_b, act_dtype=None):
    """Core entry point: x_t is (4, B_pad) in the compute dtype with B_pad a
    multiple of tile_b. Returns the raw lane-dense (2, B_pad) f32 slab.

    Training loops should keep inputs persistently in this layout and consume
    the slab directly to avoid per-step pad/transpose launches.
    """
    four, b_pad = x_t.shape
    assert four == 4, x_t.shape
    assert b_pad % tile_b == 0, (b_pad, tile_b)
    num_tiles = b_pad // tile_b

    if act_dtype is None:
        act_dtype = _activation_dtype()
    cdt = x_t.dtype

    w_in = params["w_in"].astype(cdt)     # (H, 4)
    w_mid = params["w_mid"].astype(cdt)   # (L, H, H)
    w_out = params["w_out"].astype(cdt)   # (2, H)
    b_in = params["b_in"].astype(act_dtype)    # (H, 1)
    b_mid = params["b_mid"].astype(act_dtype)  # (L, H, 1)
    b_out = params["b_out"].astype(jnp.float32)  # (2, 1) -- final add stays f32

    # Full-array blocks with constant index maps: weights/biases stay resident
    # in VMEM across all grid steps (no per-step re-DMA for unchanged blocks).
    # TODO(synk): add pipeline_mode=pl.Buffered(1) on these specs if VMEM ever
    # gets tight at large H/L (drops the unused second buffer).
    resident = lambda a: pl.BlockSpec(a.shape, lambda i: (0,) * a.ndim)

    return pl.pallas_call(
        _mlp_kernel,
        out_shape=jax.ShapeDtypeStruct((2, b_pad), jnp.float32),
        grid=(num_tiles,),
        in_specs=[
            pl.BlockSpec((4, tile_b), lambda i: (0, i)),   # x streamed per tile
            resident(w_in), resident(b_in),
            resident(w_mid), resident(b_mid),
            resident(w_out), resident(b_out),
        ],
        out_specs=pl.BlockSpec((2, tile_b), lambda i: (0, i)),
        compiler_params=pltpu.CompilerParams(
            dimension_semantics=("parallel",),       # v7x: batch over 2 TCs
            vmem_limit_bytes=32 * 1024 * 1024,       # safe on v5e/v6e/v7x
        ),
    )(x_t, w_in, b_in, w_mid, b_mid, w_out, b_out)


def nn_forward(x, params, *, tile_b=None, act_dtype=None,
               compute_dtype=jnp.bfloat16):
    """Convenience wrapper: x (B, 4) f32 -> (B, 2) f32."""
    B = x.shape[0]
    if tile_b is None:
        tile_b = _pick_tile_b(B)
    b_pad = pl.cdiv(B, tile_b) * tile_b
    # Single fused pad+cast+transpose. For hot loops, keep x upstream in the
    # (4, B_pad) layout and call nn_forward_t directly.
    x_t = jnp.pad(x.T.astype(compute_dtype), ((0, 0), (0, b_pad - B)))
    out_t = nn_forward_t(x_t, params, tile_b=tile_b, act_dtype=act_dtype)
    return out_t[:, :B].T


def init_params(key, num_hidden, dim_hidden):
    """PyTorch nn.Linear-style init: uniform(-1/sqrt(fan_in), 1/sqrt(fan_in)).

    Weights stored (out_features, in_features); biases as column vectors so the
    kernel's batch-in-lanes broadcast is a straight (F,1)+(F,TILE_B) add.
    """
    ks = jax.random.split(key, 6)

    def uniform(k, shape, fan_in):
        bound = 1.0 / math.sqrt(fan_in)
        return jax.random.uniform(k, shape, jnp.float32, -bound, bound)

    H, L = dim_hidden, num_hidden
    return {
        "w_in": uniform(ks[0], (H, 4), 4),
        "b_in": uniform(ks[1], (H, 1), 4),
        "w_mid": uniform(ks[2], (L, H, H), H),
        "b_mid": uniform(ks[3], (L, H, 1), H),
        "w_out": uniform(ks[4], (2, H), H),
        "b_out": uniform(ks[5], (2, 1), H),
    }


def nn_forward_ref(x, params, *, act_dtype=None, compute_dtype=jnp.bfloat16):
    """Pure-JAX reference mirroring the kernel's bf16-input / f32-accum math
    and the generation-gated activation dtype."""
    if act_dtype is None:
        act_dtype = _activation_dtype()
    cdt = compute_dtype

    def act(z, b):
        return jnp.tanh(z.astype(act_dtype) + b.astype(act_dtype)).astype(cdt)

    h = act(jnp.dot(params["w_in"].astype(cdt), x.T.astype(cdt),
                    preferred_element_type=jnp.float32), params["b_in"])
    for l in range(params["w_mid"].shape[0]):
        h = act(jnp.dot(params["w_mid"][l].astype(cdt), h,
                        preferred_element_type=jnp.float32), params["b_mid"][l])
    out = jnp.dot(params["w_out"].astype(cdt), h,
                  preferred_element_type=jnp.float32) + params["b_out"]
    return out.T


if __name__ == "__main__":
    num_hidden = 2     # number of middle layers
    dim_hidden = 32
    batch = 8

    key = jax.random.PRNGKey(0)
    k_params, k_x = jax.random.split(key)
    params = init_params(k_params, num_hidden, dim_hidden)
    x = jax.random.normal(k_x, (batch, 4), jnp.float32)

    out = jax.block_until_ready(nn_forward(x, params))
    ref = nn_forward_ref(x, params)

    assert out.shape == (batch, 2), out.shape
    assert jnp.allclose(out, ref, atol=2e-2, rtol=2e-2), "mismatch vs reference"

    print("KERNEL_OK")
</pallas_src>

<mosaic_0001>
module attributes {stable_mosaic.version = 11 : i64} {
  func.func @_mlp_kernel(%arg0: i32, %arg1: memref<4x128xbf16, #tpu.memory_space<vmem>>, %arg2: memref<32x4xbf16, #tpu.memory_space<vmem>>, %arg3: memref<32x1xf32, #tpu.memory_space<vmem>>, %arg4: memref<2x32x32xbf16, #tpu.memory_space<vmem>>, %arg5: memref<2x32x1xf32, #tpu.memory_space<vmem>>, %arg6: memref<2x32xbf16, #tpu.memory_space<vmem>>, %arg7: memref<2x1xf32, #tpu.memory_space<vmem>>, %arg8: memref<2x128xf32, #tpu.memory_space<vmem>>) attributes {dimension_semantics = [#tpu.dimension_semantics<parallel>], iteration_bounds = array<i64: 1>, scalar_prefetch = 0 : i64, scratch_operands = 0 : i64, tpu.core_type = #tpu.core_type<tc>, window_params = [{transform_indices = @transform_0, window_bounds = array<i64: 4, 128>}, {pipeline_mode = #tpu.pipeline_mode<synchronous>, transform_indices = @transform_1, window_bounds = array<i64: 32, 4>}, {pipeline_mode = #tpu.pipeline_mode<synchronous>, transform_indices = @transform_2, window_bounds = array<i64: 32, 1>}, {pipeline_mode = #tpu.pipeline_mode<synchronous>, transform_indices = @transform_3, window_bounds = array<i64: 2, 32, 32>}, {pipeline_mode = #tpu.pipeline_mode<synchronous>, transform_indices = @transform_4, window_bounds = array<i64: 2, 32, 1>}, {pipeline_mode = #tpu.pipeline_mode<synchronous>, transform_indices = @transform_5, window_bounds = array<i64: 2, 32>}, {pipeline_mode = #tpu.pipeline_mode<synchronous>, transform_indices = @transform_6, window_bounds = array<i64: 2, 1>}, {transform_indices = @transform_7, window_bounds = array<i64: 2, 128>}]} {
    %c0 = arith.constant 0 : index
    %c0_0 = arith.constant 0 : index
    %0 = vector.load %arg2[%c0, %c0_0] : memref<32x4xbf16, #tpu.memory_space<vmem>>, vector<32x4xbf16>
    %c0_1 = arith.constant 0 : index
    %c0_2 = arith.constant 0 : index
    %1 = vector.load %arg1[%c0_1, %c0_2] : memref<4x128xbf16, #tpu.memory_space<vmem>>, vector<4x128xbf16>
    %cst = arith.constant dense<0.000000e+00> : vector<32x128xf32>
    %2 = tpu.matmul %0, %1, %cst {dimension_numbers = #tpu.dot_dimension_numbers<[1], [0], [0], [1], [0, 0, 1, 1], [], []>} : vector<32x4xbf16>, vector<4x128xbf16>, vector<32x128xf32> -> vector<32x128xf32>
    %c0_3 = arith.constant 0 : index
    %c0_4 = arith.constant 0 : index
    %3 = vector.load %arg3[%c0_3, %c0_4] : memref<32x1xf32, #tpu.memory_space<vmem>>, vector<32x1xf32>
    %4 = vector.broadcast %3 : vector<32x1xf32> to vector<32x128xf32>
    %5 = arith.addf %2, %4 : vector<32x128xf32>
    %6 = math.tanh %5 : vector<32x128xf32>
    %7 = arith.truncf %6 : vector<32x128xf32> to vector<32x128xbf16>
    %c0_5 = arith.constant 0 : index
    %c0_6 = arith.constant 0 : index
    %c0_7 = arith.constant 0 : index
    %8 = vector.load %arg4[%c0_5, %c0_6, %c0_7] : memref<2x32x32xbf16, #tpu.memory_space<vmem>>, vector<1x32x32xbf16>
    %9 = vector.shape_cast %8 : vector<1x32x32xbf16> to vector<32x32xbf16>
    %cst_8 = arith.constant dense<0.000000e+00> : vector<32x128xf32>
    %10 = tpu.matmul %9, %7, %cst_8 {dimension_numbers = #tpu.dot_dimension_numbers<[1], [0], [0], [1], [0, 0, 1, 1], [], []>} : vector<32x32xbf16>, vector<32x128xbf16>, vector<32x128xf32> -> vector<32x128xf32>
    %c0_9 = arith.constant 0 : index
    %c0_10 = arith.constant 0 : index
    %c0_11 = arith.constant 0 : index
    %11 = vector.load %arg5[%c0_9, %c0_10, %c0_11] : memref<2x32x1xf32, #tpu.memory_space<vmem>>, vector<1x32x1xf32>
    %12 = vector.shape_cast %11 : vector<1x32x1xf32> to vector<32x1xf32>
    %13 = vector.broadcast %12 : vector<32x1xf32> to vector<32x128xf32>
    %14 = arith.addf %10, %13 : vector<32x128xf32>
    %15 = math.tanh %14 : vector<32x128xf32>
    %16 = arith.truncf %15 : vector<32x128xf32> to vector<32x128xbf16>
    %c1 = arith.constant 1 : index
    %c0_12 = arith.constant 0 : index
    %c0_13 = arith.constant 0 : index
    %17 = vector.load %arg4[%c1, %c0_12, %c0_13] : memref<2x32x32xbf16, #tpu.memory_space<vmem>>, vector<1x32x32xbf16>
    %18 = vector.shape_cast %17 : vector<1x32x32xbf16> to vector<32x32xbf16>
    %cst_14 = arith.constant dense<0.000000e+00> : vector<32x128xf32>
    %19 = tpu.matmul %18, %16, %cst_14 {dimension_numbers = #tpu.dot_dimension_numbers<[1], [0], [0], [1], [0, 0, 1, 1], [], []>} : vector<32x32xbf16>, vector<32x128xbf16>, vector<32x128xf32> -> vector<32x128xf32>
    %c1_15 = arith.constant 1 : index
    %c0_16 = arith.constant 0 : index
    %c0_17 = arith.constant 0 : index
    %20 = vector.load %arg5[%c1_15, %c0_16, %c0_17] : memref<2x32x1xf32, #tpu.memory_space<vmem>>, vector<1x32x1xf32>
    %21 = vector.shape_cast %20 : vector<1x32x1xf32> to vector<32x1xf32>
    %22 = vector.broadcast %21 : vector<32x1xf32> to vector<32x128xf32>
    %23 = arith.addf %19, %22 : vector<32x128xf32>
    %24 = math.tanh %23 : vector<32x128xf32>
    %25 = arith.truncf %24 : vector<32x128xf32> to vector<32x128xbf16>
    %c0_18 = arith.constant 0 : index
    %c0_19 = arith.constant 0 : index
    %26 = vector.load %arg6[%c0_18, %c0_19] : memref<2x32xbf16, #tpu.memory_space<vmem>>, vector<2x32xbf16>
    %cst_20 = arith.constant dense<0.000000e+00> : vector<2x128xf32>
    %27 = tpu.matmul %26, %25, %cst_20 {dimension_numbers = #tpu.dot_dimension_numbers<[1], [0], [0], [1], [0, 0, 1, 1], [], []>} : vector<2x32xbf16>, vector<32x128xbf16>, vector<2x128xf32> -> vector<2x128xf32>
    %c0_21 = arith.constant 0 : index
    %c0_22 = arith.constant 0 : index
    %28 = vector.load %arg7[%c0_21, %c0_22] : memref<2x1xf32, #tpu.memory_space<vmem>>, vector<2x1xf32>
    %29 = vector.broadcast %28 : vector<2x1xf32> to vector<2x128xf32>
    %30 = arith.addf %27, %29 : vector<2x128xf32>
    %c0_23 = arith.constant 0 : index
    %c0_24 = arith.constant 0 : index
    %31 = vector.load %arg8[%c0_23, %c0_24] : memref<2x128xf32, #tpu.memory_space<vmem>>, vector<2x128xf32>
    tpu.vector_store %arg8[%c0_23, %c0_24], %30 {strides = array<i32>} : memref<2x128xf32, #tpu.memory_space<vmem>>, vector<2x128xf32>,
    return
  }
  func.func @transform_0(%arg0: i32) -> (i32, i32) {
    %c0_i32 = arith.constant 0 : i32
    %c0_i32_0 = arith.constant 0 : i32
    return %c0_i32, %arg0 : i32, i32
  }
  func.func @transform_1(%arg0: i32) -> (i32, i32) {
    %c0_i32 = arith.constant 0 : i32
    %c0_i32_0 = arith.constant 0 : i32
    %c0_i32_1 = arith.constant 0 : i32
    return %c0_i32, %c0_i32_0 : i32, i32
  }
  func.func @transform_2(%arg0: i32) -> (i32, i32) {
    %c0_i32 = arith.constant 0 : i32
    %c0_i32_0 = arith.constant 0 : i32
    %c0_i32_1 = arith.constant 0 : i32
    return %c0_i32, %c0_i32_0 : i32, i32
  }
  func.func @transform_3(%arg0: i32) -> (i32, i32, i32) {
    %c0_i32 = arith.constant 0 : i32
    %c0_i32_0 = arith.constant 0 : i32
    %c0_i32_1 = arith.constant 0 : i32
    %c0_i32_2 = arith.constant 0 : i32
    return %c0_i32, %c0_i32_0, %c0_i32_1 : i32, i32, i32
  }
  func.func @transform_4(%arg0: i32) -> (i32, i32, i32) {
    %c0_i32 = arith.constant 0 : i32
    %c0_i32_0 = arith.constant 0 : i32
    %c0_i32_1 = arith.constant 0 : i32
    %c0_i32_2 = arith.constant 0 : i32
    return %c0_i32, %c0_i32_0, %c0_i32_1 : i32, i32, i32
  }
  func.func @transform_5(%arg0: i32) -> (i32, i32) {
    %c0_i32 = arith.constant 0 : i32
    %c0_i32_0 = arith.constant 0 : i32
    %c0_i32_1 = arith.constant 0 : i32
    return %c0_i32, %c0_i32_0 : i32, i32
  }
  func.func @transform_6(%arg0: i32) -> (i32, i32) {
    %c0_i32 = arith.constant 0 : i32
    %c0_i32_0 = arith.constant 0 : i32
    %c0_i32_1 = arith.constant 0 : i32
    return %c0_i32, %c0_i32_0 : i32, i32
  }
  func.func @transform_7(%arg0: i32) -> (i32, i32) {
    %c0_i32 = arith.constant 0 : i32
    %c0_i32_0 = arith.constant 0 : i32
    return %c0_i32, %arg0 : i32, i32
  }
}

</mosaic_0001>

<bundles_post_ra>
// kernel: tpu_custom_call.1
= control target key start
LH: loop header
LB: loop body
LE: loop exit
PB: predicated region body
PF: predicated region fallthrough
CT: control target
= control target key end

     0   :  { %vm74_vm0 = vcmask 1041408   ;;  %v384_v2 = vmov 0   ;;  %vm67_vm1 = vcmask 31744   ;;  %s497_s0 = inlined_call_operand.vmem [shape: bf16[4,128], index: 0, kind: input, shape index: {}]   ;;  %s498_s1 = inlined_call_operand.vmem [shape: bf16[32,4], index: 1, kind: input, shape index: {}]   ;;  %s499_s2 = inlined_call_operand.vmem [shape: f32[32,1], index: 2, kind: input, shape index: {}]   ;;  %s500_s3 = inlined_call_operand.vmem [shape: bf16[2,32,32], index: 3, kind: input, shape index: {}]   ;;  %s501_s4 = inlined_call_operand.vmem [shape: f32[2,32,1], index: 4, kind: input, shape index: {}]   ;;  %s502_s5 = inlined_call_operand.vmem [shape: bf16[2,32], index: 5, kind: input, shape index: {}]   ;;  %s503_s6 = inlined_call_operand.vmem [shape: f32[2,1], index: 6, kind: input, shape index: {}]   ;;  %s504_s7 = inlined_call_operand.hbm [shape: f32[2,128], index: 7, kind: output, shape index: {}]  }
   0x1   :  { %v35_v0 = vld [vmem:[%s499_s2 + $0x10] sm:$0xff]  ;;  %v32_v1 = vld [vmem:[%s497_s0] sm:$0x3]  ;;  %331 = vset.pattern.permute.xlu0 %v384_v2  ;;  %332 = vset.pattern.permute.xlu1 %v384_v2 }
   0x2   :  { %v76_v3 = vsel %vm74_vm0, %v32_v1, 0  ;;  %v323_v4 = vld [vmem:[%s498_s1] sm:$0xff]  ;;  %49 = vperm.xlu0 %331, %v35_v0   ;;  %333 = vset.pattern.permute.xlu2 %v384_v2 }
   0x3   :  { %v33_v5 = vld [vmem:[%s499_s2] sm:$0xff]  ;;  %85 = vmatpush.bf16.msra.mxu0 %v76_v3 }
   0x4   :  { %39 = vperm.xlu1 %332, %v33_v5  }
   0x5   :  { %12 = vsyncpa [#allocation3], 0  ;;  %v36_v6 = vld [vmem:[%s499_s2 + $0x18] sm:$0xff]  ;;  %v34_v7 = vld [vmem:[%s499_s2 + $0x8] sm:$0xff]  ;;  %vm141_vm2 = vcmask 261120   ;;  %s385_s13 = smov [#allocation2]  }
   0x6   :  { %292 = vmatmul.msk.bf16.vlgmr.msra.gmra.mxu0 %vm67_vm1, %v323_v4  ;;  %v107_v8 = vld [vmem:[%s501_s4] sm:$0xff]  ;;  %v108_v9 = vld [vmem:[%s501_s4 + $0x8] sm:$0xff]  ;;  %v311_v11 = vld [vmem:[%s501_s4 + $0x38] sm:$0xff]  ;;  %s273_s14 = sshll.u32 %s385_s13, 4  ;;  %s275_s17 = sshll.u32 %s504_s7, 4  ;;  %s274_s14 = int_to_ptr.vmem [resolvable:$true] %s273_s14  ;;  %s276_s17 = int_to_ptr.hbm [resolvable:$true] %s275_s17 }
   0x7   :  { %v324_v10 = vld [vmem:[%s498_s1 + $0x8] sm:$0xff]  ;;  %v308_v12 = vld [vmem:[%s501_s4 + $0x20] sm:$0xff]  ;;  %v109_v26 = vld [vmem:[%s501_s4 + $0x10] sm:$0xff] }
   0x8   :  { %v245_v13 = vld [vmem:[%s503_s6] sm:$0x3]  ;;  %123 = vperm.xlu2 %333, %v109_v26   ;;  %v110_v29 = vld [vmem:[%s501_s4 + $0x18] sm:$0xff]  ;;  %v310_v35 = vld [vmem:[%s501_s4 + $0x30] sm:$0xff] }
   0x9   :  { %v325_v34 = vld [vmem:[%s500_s3] sm:$0xff]  ;;  %v309_v36 = vld [vmem:[%s501_s4 + $0x28] sm:$0xff]  ;;  %v327_v56 = vld [vmem:[%s500_s3 + $0x10] sm:$0xff] }
   0xa   :  { %54 = vperm.xlu0 %331, %v36_v6   ;;  %v326_v37 = vld [vmem:[%s500_s3 + $0x8] sm:$0xff]  ;;  %v328_v57 = vld [vmem:[%s500_s3 + $0x18] sm:$0xff] }
   0xc   :  { %44 = vperm.xlu1 %332, %v34_v7  }
  0x10   :  { %128 = vperm.xlu2 %333, %v110_v29  }
  0x12   :  { %113 = vperm.xlu0 %331, %v107_v8  }
  0x14   :  { %118 = vperm.xlu1 %332, %v108_v9  }
  0x16   :  { %293 = vmatmul.msk.bf16.gmra.mxu0 %vm67_vm1, %v324_v10 }
  0x18   :  { %195 = vperm.xlu2 %333, %v310_v35  }
  0x1a   :  { %200 = vperm.xlu0 %331, %v311_v11  }
  0x1c   :  { %185 = vperm.xlu1 %332, %v308_v12   ;;  %v244_v12 = vld [vmem:[%s502_s5] sm:$0x1] }
  0x20   :  { %190 = vperm.xlu2 %333, %v309_v36  }
  0x22   :  { %248 = vperm.xlu0 %331, %v245_v13  }
  0x62   :  { %v124_v40 = vpop.permute.xlu2 %123 }
  0x6a   :  { %v129_v44 = vpop.permute.xlu2 %128 }
  0x72   :  { %v196_v60 = vpop.permute.xlu2 %195 }
  0x74   :  { %v50_v16 = vpop.permute.xlu0 %49 }
  0x76   :  { %v40_v17 = vpop.permute.xlu1 %39 }
  0x7a   :  { %v191_v0 = vpop.permute.xlu2 %190 }
  0x7c   :  { %v55_v20 = vpop.permute.xlu0 %54 }
  0x7e   :  { %v45_v21 = vpop.permute.xlu1 %44 }
  0x83   :  { %v87_v14 = vpop.f32.mrf.mxu0 }
  0x84   :  { %v88_v25 = vadd.f32 %v87_v14, %v40_v17  ;;  %v114_v48 = vpop.permute.xlu0 %113 }
  0x86   :  { %v119_v43 = vpop.permute.xlu1 %118 }
  0x8b   :  { %v89_v15 = vpop.f32.mrf.mxu0 }
  0x8c   :  { %v90_v23 = vadd.f32 %v89_v15, %v45_v21  ;;  %v201_v63 = vpop.permute.xlu0 %200 }
  0x8e   :  { %v186_v4 = vpop.permute.xlu1 %185 }
  0x93   :  { %v92_v18 = vpop.f32.mrf.mxu0 }
  0x94   :  { %v93_v19 = vadd.f32 %v92_v18, %v50_v16  ;;  %v249_v13 = vpop.permute.xlu0 %248 }
  0x96   :  { %334 = vtanh.f32 %v93_v19 }
  0x9b   :  { %v94_v22 = vpop.f32.mrf.mxu0 }
  0x9c   :  { %v95_v24 = vadd.f32 %v94_v22, %v55_v20  ;;  %v335_v27 = vpop.eup %334 }
  0x9e   :  { %336 = vtanh.f32 %v95_v24 }
  0x9f   :  { %338 = vtanh.f32 %v90_v23 }
  0xa0   :  { %340 = vtanh.f32 %v88_v25 }
  0xa4   :  { %v337_v28 = vpop.eup %336 }
  0xa5   :  { %v102_v30 = vpack.c.bf16 %v337_v28, %v335_v27  ;;  %v339_v31 = vpop.eup %338 }
  0xa6   :  { %v341_v32 = vpop.eup %340 }
  0xa7   :  { %154 = vmatpush.bf16.msra.mxu1 %v102_v30  ;;  %v101_v33 = vpack.c.bf16 %v339_v31, %v341_v32 }
  0xab   :  { %155 = vmatpush.bf16.msra.mxu1 %v101_v33 }
  0xae   :  { %302 = vmatmul.msk.bf16.vlgmr.msra.gmra.mxu1 %vm141_vm2, %v325_v34 }
  0xbe   :  { %303 = vmatmul.msk.bf16.gmra.mxu1 %vm141_vm2, %v326_v37 }
 0x12b   :  { %v157_v38 = vpop.f32.mrf.mxu1 }
 0x12c   :  { %v158_v49 = vadd.f32 %v157_v38, %v114_v48 }
 0x133   :  { %v159_v39 = vpop.f32.mrf.mxu1 }
 0x134   :  { %v160_v46 = vadd.f32 %v159_v39, %v119_v43 }
 0x13b   :  { %v162_v41 = vpop.f32.mrf.mxu1 }
 0x13c   :  { %v163_v42 = vadd.f32 %v162_v41, %v124_v40 }
 0x13e   :  { %342 = vtanh.f32 %v163_v42 }
 0x143   :  { %v164_v45 = vpop.f32.mrf.mxu1 }
 0x144   :  { %v165_v47 = vadd.f32 %v164_v45, %v129_v44  ;;  %v343_v50 = vpop.eup %342 }
 0x146   :  { %344 = vtanh.f32 %v165_v47 }
 0x147   :  { %346 = vtanh.f32 %v160_v46 }
 0x148   :  { %348 = vtanh.f32 %v158_v49 }
 0x14c   :  { %v345_v51 = vpop.eup %344 }
 0x14d   :  { %v172_v52 = vpack.c.bf16 %v345_v51, %v343_v50  ;;  %v347_v53 = vpop.eup %346 }
 0x14e   :  { %v349_v54 = vpop.eup %348 }
 0x14f   :  { %225 = vmatpush.bf16.msra.mxu2 %v172_v52  ;;  %v171_v55 = vpack.c.bf16 %v347_v53, %v349_v54 }
 0x153   :  { %226 = vmatpush.bf16.msra.mxu2 %v171_v55 }
 0x156   :  { %320 = vmatmul.msk.bf16.vlgmr.msra.gmra.mxu2 %vm141_vm2, %v327_v56 }
 0x166   :  { %321 = vmatmul.msk.bf16.gmra.mxu2 %vm141_vm2, %v328_v57 }
 0x1d9   :  { %v228_v58 = vpop.f32.mrf.mxu2 }
 0x1da   :  { %v229_v5 = vadd.f32 %v228_v58, %v186_v4 }
 0x1e1   :  { %v230_v59 = vpop.f32.mrf.mxu2 }
 0x1e2   :  { %v231_v2 = vadd.f32 %v230_v59, %v191_v0 }
 0x1e9   :  { %v233_v61 = vpop.f32.mrf.mxu2 }
 0x1ea   :  { %v234_v62 = vadd.f32 %v233_v61, %v196_v60 }
 0x1ec   :  { %350 = vtanh.f32 %v234_v62 }
 0x1f1   :  { %v235_v1 = vpop.f32.mrf.mxu2 }
 0x1f2   :  { %v236_v3 = vadd.f32 %v235_v1, %v201_v63  ;;  %v351_v6 = vpop.eup %350 }
 0x1f4   :  { %352 = vtanh.f32 %v236_v3 }
 0x1f5   :  { %354 = vtanh.f32 %v231_v2 }
 0x1f6   :  { %356 = vtanh.f32 %v229_v5 }
 0x1fa   :  { %v353_v7 = vpop.eup %352 }
 0x1fb   :  { %v243_v8 = vpack.c.bf16 %v353_v7, %v351_v6  ;;  %v355_v9 = vpop.eup %354 }
 0x1fc   :  { %v357_v10 = vpop.eup %356 }
 0x1fd   :  { %260 = vmatpush.bf16.msra.mxu3 %v243_v8  ;;  %v242_v11 = vpack.c.bf16 %v355_v9, %v357_v10 }
 0x201   :  { %261 = vmatpush.bf16.msra.mxu3 %v242_v11 }
 0x204   :  { %322 = vmatmul.msk.bf16.vlgmr.msra.gmra.mxu3 %vm141_vm2, %v244_v12 }
 0x287   :  { %v263_v14 = vpop.f32.mrf.mxu3 }
 0x288   :  { %v264_v15 = vadd.f32 %v263_v14, %v249_v13 }
 0x28a   :  { %267 = vst [vmem:[#allocation2] sm:$0x3] %v264_v15 }
 0x28b   :  { %278 = dma.vmem_to_hbm [thread:$0]  %s274_s14, 32, %s276_s17, [#allocation3]  }
 0x28f   :  { %v265_v16 = vpop.f32.mrf.mxu3 }
 0x290   :  { %382 = dma.done.wait [#allocation3], 32  }
 0x291   :  { %383 = vsyncadd [#allocation3], 4294967264 }
 0x292   :  { %283 = vsyncpa [#allocation3], 1 }

</bundles_post_ra>
